<compile_context>
chip_gen: v7x
topology: tpu7x:2x2x1
jax: 0.10.0
libtpu: 0.0.40
codegen_flags: <defaults>
</compile_context>

<pallas_src>
import functools

import jax
import jax.numpy as jnp
from jax.experimental import pallas as pl
from jax.experimental.pallas import tpu as pltpu


def _round_up(n, m):
    return ((n + m - 1) // m) * m


def _cdiv(a, b):
    return (a + b - 1) // b


def _ste_kernel(x_ref, t_ref, w1_ref, b1_ref, wcat_ref, o_ref, hc_ref):
    # x_ref: (TB, 1) f32, t_ref: (TB, 1) i32
    # hc_ref: (TB, H + T_pad) VMEM scratch (f32 or bf16) holding [tanh(h) | one_hot(t)]
    H = w1_ref.shape[1]
    T_pad = hc_ref.shape[1] - H
    TB = x_ref.shape[0]
    cdt = hc_ref.dtype

    # Linear(1, H): rank-1 outer product via lane-broadcast multiply (VPU) + tanh (EUP).
    hc_ref[:, :H] = jnp.tanh(x_ref[...] * w1_ref[...] + b1_ref[...]).astype(cdt)

    # Embedding lookup as a one-hot row selector (avoids a data-dependent gather).
    lane_iota = jax.lax.broadcasted_iota(jnp.int32, (TB, T_pad), 1)
    hc_ref[:, H:] = (lane_iota == t_ref[...]).astype(cdt)

    # Single fused MXU matmul: [h | onehot] @ [[W2], [emb_pad + b2]]
    #   == (h @ W2 + b2) + emb[t]  ==  x_enc + t_enc      (b2 folded into emb rows)
    o_ref[...] = jnp.dot(hc_ref[...], wcat_ref[...],
                         preferred_element_type=jnp.float32).astype(o_ref.dtype)


def spatio_temporal_encoding(x, t_steps, params, *, block_b=2048):
    """x: (B, 1) f32, t_steps: (B,) or (B, 1) int-like. Returns (B, 1, D) f32."""
    w1, b1, w_cat = params
    B = x.shape[0]
    H = w1.shape[1]
    K, D = w_cat.shape            # K = H + T_pad

    # Lane-alignment requirements for the aligned scratch split and lane-dense vst.
    assert H % 128 == 0, f"d_model//2 must be a multiple of 128, got {H}"
    assert D % 128 == 0, f"d_model must be a multiple of 128, got {D}"
    assert K % 128 == 0, f"H + T_pad must be a multiple of 128, got {K}"

    # PyTorch: t_steps.squeeze().long()
    t_idx = jnp.reshape(t_steps, (B,)).astype(jnp.int32).reshape(B, 1)
    x = x.astype(jnp.float32).reshape(B, 1)

    # Balanced batch tiling: keep tiles <= block_b, sublane-aligned (multiple of 8),
    # with padding waste bounded by 7 rows. Split a single huge tile into >= 2 grid
    # steps so both v7x TensorCores get batch tiles ("parallel" axis).
    num_tiles = max(1, _cdiv(B, block_b))
    if num_tiles == 1 and B >= 1024:
        num_tiles = 2
    tb = max(8, _round_up(_cdiv(B, num_tiles), 8))
    B_pad = tb * num_tiles
    if B_pad != B:
        x = jnp.pad(x, ((0, B_pad - B), (0, 0)))
        t_idx = jnp.pad(t_idx, ((0, B_pad - B), (0, 0)))
    grid = (num_tiles,)

    # Scratch / compute dtype follows W_cat (f32 exact path, or bf16 fast path).
    cdt = w_cat.dtype
    c_item = jnp.dtype(cdt).itemsize

    # Estimated per-step VMEM working set; only raise the scoped limit if we exceed
    # the 32 MiB default (possible when callers push very large block_b in f32).
    vmem_est = (2 * tb * D * 4                       # double-buffered f32 output
                + tb * K * c_item                    # hc scratch
                + 2 * tb * (4 + 4)                   # x + t (double-buffered)
                + 2 * (K * D * c_item + 2 * H * 4))  # resident weights (dbl-buffered)
    cp_kwargs = dict(dimension_semantics=("parallel",))
    if vmem_est > (32 << 20):
        cp_kwargs["vmem_limit_bytes"] = min(int(vmem_est * 1.25), 64 << 20)

    out = pl.pallas_call(
        _ste_kernel,
        out_shape=jax.ShapeDtypeStruct((B_pad, D), jnp.float32),
        grid_spec=pltpu.PrefetchScalarGridSpec(
            num_scalar_prefetch=0,
            grid=grid,
            in_specs=[
                pl.BlockSpec((tb, 1), lambda i: (i, 0)),   # x        (per-tile)
                pl.BlockSpec((tb, 1), lambda i: (i, 0)),   # t_idx    (per-tile)
                pl.BlockSpec((1, H), lambda i: (0, 0)),    # w1       (resident)
                pl.BlockSpec((1, H), lambda i: (0, 0)),    # b1       (resident)
                pl.BlockSpec((K, D), lambda i: (0, 0)),    # W_cat    (resident)
            ],
            out_specs=pl.BlockSpec((tb, D), lambda i: (i, 0)),
            scratch_shapes=[pltpu.VMEM((tb, K), cdt)],
        ),
        compiler_params=pltpu.CompilerParams(**cp_kwargs),
    )(x, t_idx, w1, b1, w_cat)

    return out[:B, None, :]       # unsqueeze(1) -> (B, 1, D)


def init_params(key, d_model=256, max_time_steps=100, compute_dtype=jnp.float32):
    """Returns (kernel_params, ref_params).

    kernel_params = (w1, b1, w_cat) where w_cat = [[W2], [emb_pad + b2]] in compute_dtype.
    ref_params    = (w1, b1, w2, b2, emb) in f32 for the pure-JAX reference.
    """
    H = d_model // 2
    k1, k2, k3, k4, k5 = jax.random.split(key, 5)
    # Linear(1, H): PyTorch weight (H, 1) -> stored transposed (1, H)
    w1 = jax.random.normal(k1, (1, H), jnp.float32) * 0.5
    b1 = jax.random.normal(k2, (1, H), jnp.float32) * 0.1
    # Linear(H, D): PyTorch weight (D, H) -> stored transposed (H, D)
    w2 = jax.random.normal(k3, (H, d_model), jnp.float32) * (float(H) ** -0.5)
    b2 = jax.random.normal(k4, (1, d_model), jnp.float32) * 0.1
    # Embedding(max_time_steps, D), padded to a lane-aligned row count, with b2 folded
    # into the (in-range) embedding rows: onehot @ (emb + b2) == emb[t] + b2.
    emb = jax.random.normal(k5, (max_time_steps, d_model), jnp.float32)
    T_pad = _round_up(max_time_steps, 128)
    emb_pad = jnp.zeros((T_pad, d_model), jnp.float32).at[:max_time_steps].set(emb + b2)
    # Fused contraction operand: a single (H + T_pad, D) matrix.
    w_cat = jnp.concatenate([w2, emb_pad], axis=0).astype(compute_dtype)
    kernel_params = (w1, b1, w_cat)
    ref_params = (w1, b1, w2, b2, emb)
    return kernel_params, ref_params


def reference(x, t_steps, ref_params):
    """Pure-JAX reference of the PyTorch forward."""
    w1, b1, w2, b2, emb = ref_params
    h = jnp.tanh(x @ w1 + b1)
    x_enc = h @ w2 + b2
    t_idx = jnp.reshape(t_steps, (-1,)).astype(jnp.int32)
    t_enc = emb[t_idx]
    return (x_enc + t_enc)[:, None, :]


if __name__ == "__main__":
    d_model = 256
    max_time_steps = 100
    B = 8

    key = jax.random.PRNGKey(0)
    kp, kx, kt = jax.random.split(key, 3)

    x = jax.random.normal(kx, (B, 1), jnp.float32)
    t_steps = jax.random.randint(kt, (B, 1), 0, max_time_steps, jnp.int32)

    # Exact f32 path.
    kernel_params, ref_params = init_params(kp, d_model, max_time_steps,
                                            compute_dtype=jnp.float32)
    out = spatio_temporal_encoding(x, t_steps, kernel_params)
    out = jax.block_until_ready(out)

    ref = reference(x, t_steps, ref_params)
    assert out.shape == (B, 1, d_model), out.shape
    err = float(jnp.max(jnp.abs(out - ref)))
    assert jnp.allclose(out, ref, atol=1e-4, rtol=1e-4), err

    # Fast bf16 path (reduced precision in the MXU operands; f32 accumulation).
    kernel_params_bf16, _ = init_params(kp, d_model, max_time_steps,
                                        compute_dtype=jnp.bfloat16)
    out_bf16 = spatio_temporal_encoding(x, t_steps, kernel_params_bf16)
    out_bf16 = jax.block_until_ready(out_bf16)
    err_bf16 = float(jnp.max(jnp.abs(out_bf16 - ref)))
    assert jnp.allclose(out_bf16, ref, atol=1e-1, rtol=1e-1), err_bf16

    print("KERNEL_OK")
</pallas_src>

<mosaic_0001>
module attributes {stable_mosaic.version = 11 : i64} {
  func.func @_ste_kernel(%arg0: i32, %arg1: memref<8x1xf32, #tpu.memory_space<vmem>>, %arg2: memref<8x1xi32, #tpu.memory_space<vmem>>, %arg3: memref<1x128xf32, #tpu.memory_space<vmem>>, %arg4: memref<1x128xf32, #tpu.memory_space<vmem>>, %arg5: memref<256x256xf32, #tpu.memory_space<vmem>>, %arg6: memref<8x256xf32, #tpu.memory_space<vmem>>, %arg7: memref<8x256xf32, #tpu.memory_space<vmem>>) attributes {dimension_semantics = [#tpu.dimension_semantics<parallel>], iteration_bounds = array<i64: 1>, scalar_prefetch = 0 : i64, scratch_operands = 1 : i64, tpu.core_type = #tpu.core_type<tc>, window_params = [{transform_indices = @transform_0, window_bounds = array<i64: 8, 1>}, {transform_indices = @transform_1, window_bounds = array<i64: 8, 1>}, {pipeline_mode = #tpu.pipeline_mode<synchronous>, transform_indices = @transform_2, window_bounds = array<i64: 1, 128>}, {pipeline_mode = #tpu.pipeline_mode<synchronous>, transform_indices = @transform_3, window_bounds = array<i64: 1, 128>}, {pipeline_mode = #tpu.pipeline_mode<synchronous>, transform_indices = @transform_4, window_bounds = array<i64: 256, 256>}, {transform_indices = @transform_5, window_bounds = array<i64: 8, 256>}]} {
    %c0 = arith.constant 0 : index
    %c0_0 = arith.constant 0 : index
    %0 = vector.load %arg1[%c0, %c0_0] : memref<8x1xf32, #tpu.memory_space<vmem>>, vector<8x1xf32>
    %c0_1 = arith.constant 0 : index
    %c0_2 = arith.constant 0 : index
    %1 = vector.load %arg3[%c0_1, %c0_2] : memref<1x128xf32, #tpu.memory_space<vmem>>, vector<1x128xf32>
    %2 = vector.broadcast %0 : vector<8x1xf32> to vector<8x128xf32>
    %3 = vector.broadcast %1 : vector<1x128xf32> to vector<8x128xf32>
    %4 = arith.mulf %2, %3 : vector<8x128xf32>
    %c0_3 = arith.constant 0 : index
    %c0_4 = arith.constant 0 : index
    %5 = vector.load %arg4[%c0_3, %c0_4] : memref<1x128xf32, #tpu.memory_space<vmem>>, vector<1x128xf32>
    %6 = vector.broadcast %5 : vector<1x128xf32> to vector<8x128xf32>
    %7 = arith.addf %4, %6 : vector<8x128xf32>
    %8 = math.tanh %7 : vector<8x128xf32>
    %c0_5 = arith.constant 0 : index
    %c0_6 = arith.constant 0 : index
    %9 = vector.load %arg7[%c0_5, %c0_6] : memref<8x256xf32, #tpu.memory_space<vmem>>, vector<8x128xf32>
    tpu.vector_store %arg7[%c0_5, %c0_6], %8 {strides = array<i32>} : memref<8x256xf32, #tpu.memory_space<vmem>>, vector<8x128xf32>,
    %10 = tpu.iota {dimensions = array<i32: 1>} : vector<8x128xi32>
    %c0_7 = arith.constant 0 : index
    %c0_8 = arith.constant 0 : index
    %11 = vector.load %arg2[%c0_7, %c0_8] : memref<8x1xi32, #tpu.memory_space<vmem>>, vector<8x1xi32>
    %12 = vector.broadcast %11 : vector<8x1xi32> to vector<8x128xi32>
    %13 = arith.cmpi eq, %10, %12 : vector<8x128xi32>
    %14 = arith.extui %13 : vector<8x128xi1> to vector<8x128xi32>
    %15 = arith.sitofp %14 : vector<8x128xi32> to vector<8x128xf32>
    %c0_9 = arith.constant 0 : index
    %c128 = arith.constant 128 : index
    %16 = vector.load %arg7[%c0_9, %c128] : memref<8x256xf32, #tpu.memory_space<vmem>>, vector<8x128xf32>
    tpu.vector_store %arg7[%c0_9, %c128], %15 {strides = array<i32>} : memref<8x256xf32, #tpu.memory_space<vmem>>, vector<8x128xf32>,
    %c0_10 = arith.constant 0 : index
    %c0_11 = arith.constant 0 : index
    %17 = vector.load %arg7[%c0_10, %c0_11] : memref<8x256xf32, #tpu.memory_space<vmem>>, vector<8x256xf32>
    %c0_12 = arith.constant 0 : index
    %c0_13 = arith.constant 0 : index
    %18 = vector.load %arg5[%c0_12, %c0_13] : memref<256x256xf32, #tpu.memory_space<vmem>>, vector<256x256xf32>
    %cst = arith.constant dense<0.000000e+00> : vector<8x256xf32>
    %19 = tpu.matmul %17, %18, %cst {dimension_numbers = #tpu.dot_dimension_numbers<[1], [0], [0], [1], [0, 0, 1, 1], [], []>} : vector<8x256xf32>, vector<256x256xf32>, vector<8x256xf32> -> vector<8x256xf32>
    %c0_14 = arith.constant 0 : index
    %c0_15 = arith.constant 0 : index
    %20 = vector.load %arg6[%c0_14, %c0_15] : memref<8x256xf32, #tpu.memory_space<vmem>>, vector<8x256xf32>
    tpu.vector_store %arg6[%c0_14, %c0_15], %19 {strides = array<i32>} : memref<8x256xf32, #tpu.memory_space<vmem>>, vector<8x256xf32>,
    return
  }
  func.func @transform_0(%arg0: i32) -> (i32, i32) {
    %c0_i32 = arith.constant 0 : i32
    %c0_i32_0 = arith.constant 0 : i32
    return %arg0, %c0_i32 : i32, i32
  }
  func.func @transform_1(%arg0: i32) -> (i32, i32) {
    %c0_i32 = arith.constant 0 : i32
    %c0_i32_0 = arith.constant 0 : i32
    return %arg0, %c0_i32 : i32, i32
  }
  func.func @transform_2(%arg0: i32) -> (i32, i32) {
    %c0_i32 = arith.constant 0 : i32
    %c0_i32_0 = arith.constant 0 : i32
    %c0_i32_1 = arith.constant 0 : i32
    return %c0_i32, %c0_i32_0 : i32, i32
  }
  func.func @transform_3(%arg0: i32) -> (i32, i32) {
    %c0_i32 = arith.constant 0 : i32
    %c0_i32_0 = arith.constant 0 : i32
    %c0_i32_1 = arith.constant 0 : i32
    return %c0_i32, %c0_i32_0 : i32, i32
  }
  func.func @transform_4(%arg0: i32) -> (i32, i32) {
    %c0_i32 = arith.constant 0 : i32
    %c0_i32_0 = arith.constant 0 : i32
    %c0_i32_1 = arith.constant 0 : i32
    return %c0_i32, %c0_i32_0 : i32, i32
  }
  func.func @transform_5(%arg0: i32) -> (i32, i32) {
    %c0_i32 = arith.constant 0 : i32
    %c0_i32_0 = arith.constant 0 : i32
    return %arg0, %c0_i32 : i32, i32
  }
}

</mosaic_0001>

<bundles_post_ra>
// kernel: tpu_custom_call.1
= control target key start
LH: loop header
LB: loop body
LE: loop exit
PB: predicated region body
PF: predicated region fallthrough
CT: control target
= control target key end

     0   :  { %10 = vsyncpa [#allocation4], 0  ;;  %s420_s0 = inlined_call_operand.vmem [shape: f32[8,1], index: 0, kind: input, shape index: {}]   ;;  %s421_s1 = inlined_call_operand.vmem [shape: s32[8,1], index: 1, kind: input, shape index: {}]   ;;  %s422_s2 = inlined_call_operand.vmem [shape: f32[1,128], index: 2, kind: input, shape index: {}]   ;;  %s423_s3 = inlined_call_operand.vmem [shape: f32[1,128], index: 3, kind: input, shape index: {}]   ;;  %s424_s4 = inlined_call_operand.hbm [shape: f32[256,256], index: 4, kind: input, shape index: {}]   ;;  %s425_s5 = inlined_call_operand.hbm [shape: f32[8,256], index: 5, kind: output, shape index: {}]  }
   0x1   :  { %11 = vsyncpa [#allocation5], 0  ;;  %s348_s18 = smov [#allocation3]   ;;  %s300_s22 = scalar_lea.hbm %s424_s4, 8192 }
   0x2   :  { %s25_s19 = sshll.u32 %s348_s18, 4  ;;  %p301_p0 = scmp.ne.s32.totalorder %s424_s4, %s300_s22  ;;  %s26_s19 = int_to_ptr.vmem [resolvable:$true] %s25_s19 }
   0x3   :  { %p304_p1 = scmp.lt.u32.totalorder %s300_s22, %s424_s4 }
   0x5   :  { %p306_p2 = pnand %p304_p1, %p301_p0 }
   0x7   :  { %309 = shalt.err (!%p306_p2)
}
   0x8   :  { %s310_s27 = scalar_lea.vmem %s26_s19, 8192  ;;  %p315_p4 = scmp.lt.s32.totalorder %s26_s19, %s26_s19 }
   0x9   :  { %p311_p3 = scmp.ne.s32.totalorder %s26_s19, %s310_s27  ;;  %p316_p5 = scmp.lt.s32.totalorder %s310_s27, %s310_s27 }
   0xb   :  { %p317_p6 = por %p316_p5, %p315_p4 }
   0xd   :  { %p318_p7 = pnand %p317_p6, %p311_p3 }
   0xf   :  { %321 = shalt.err (!%p318_p7)
}
  0x10   :  { %s349_s28 = smov 256   ;;  %s350_s29 = smov 16  }
  0x11   :  { %31 = dma.hbm_to_vmem [thread:$0]  %s424_s4, 8192, %s26_s19, [#allocation4], %s349_s28, %s349_s28, %s350_s29  }
  0x12   :  { %344 = dma.done.wait [#allocation4], 8192  }
  0x13   :  { %345 = vsyncadd [#allocation4], 4294959104  ;;  %v351_v0 = vmov 0   ;;  %v35_v1 = vld [vmem:[%s420_s0] sm:$0xff]  ;;  %v72_v3 = vld [vmem:[#allocation3 + $0x8] sm:$0xff]  ;;  %s353_s12 = smov [#allocation6]  }
  0x14   :  { %297 = vset.pattern.permute.xlu0 %v351_v0  ;;  %v61_v2 = vld [vmem:[%s421_s1] sm:$0xff]  ;;  %v71_v5 = vld [vmem:[#allocation3] sm:$0xff]  ;;  %v73_v6 = vld [vmem:[#allocation3 + $0x10] sm:$0xff]  ;;  %s214_s13 = sshll.u32 %s353_s12, 4  ;;  %s215_s13 = int_to_ptr.vmem [resolvable:$true] %s214_s13 }
  0x15   :  { %39 = vperm.xlu0 %297, %v35_v1   ;;  %v74_v4 = vld [vmem:[#allocation3 + $0x18] sm:$0xff]  ;;  %v229_v8 = vpack.c.bf16 %v73_v6, %v71_v5  ;;  %v76_v9 = vld [vmem:[#allocation3 + $0x28] sm:$0xff]  ;;  %v75_v11 = vld [vmem:[#allocation3 + $0x20] sm:$0xff]  ;;  %p327_p9 = scmp.lt.s32.totalorder %s215_s13, %s215_s13 }
  0x16   :  { %v227_v7 = vpack.c.bf16 %v74_v4, %v72_v3  ;;  %v78_v10 = vld [vmem:[#allocation3 + $0x38] sm:$0xff]  ;;  %v77_v13 = vld [vmem:[#allocation3 + $0x30] sm:$0xff]  ;;  %v80_v14 = vld [vmem:[#allocation3 + $0x48] sm:$0xff] }
  0x17   :  { %v231_v12 = vpack.c.bf16 %v78_v10, %v76_v9  ;;  %v82_v15 = vld [vmem:[#allocation3 + $0x58] sm:$0xff]  ;;  %v233_v16 = vpack.c.bf16 %v77_v13, %v75_v11  ;;  %v79_v18 = vld [vmem:[#allocation3 + $0x40] sm:$0xff]  ;;  %v81_v19 = vld [vmem:[#allocation3 + $0x50] sm:$0xff] }
  0x18   :  { %228 = vmatprep.subr.bf16.mxu0 %v227_v7  ;;  %v235_v17 = vpack.c.bf16 %v82_v15, %v80_v14  ;;  %v84_v20 = vld [vmem:[#allocation3 + $0x68] sm:$0xff]  ;;  %v86_v21 = vld [vmem:[#allocation3 + $0x78] sm:$0xff]  ;;  %v237_v22 = vpack.c.bf16 %v81_v19, %v79_v18  ;;  %v83_v24 = vld [vmem:[#allocation3 + $0x60] sm:$0xff] }
  0x19   :  { %63 = vperm.xlu0 %297, %v61_v2   ;;  %230 = vmatpush1.bf16.msra.mxu0 %v229_v8  ;;  %v239_v23 = vpack.c.bf16 %v86_v21, %v84_v20  ;;  %v85_v25 = vld [vmem:[#allocation3 + $0x70] sm:$0xff]  ;;  %v88_v26 = vld [vmem:[#allocation3 + $0x88] sm:$0xff]  ;;  %v90_v27 = vld [vmem:[#allocation3 + $0x98] sm:$0xff] }
  0x1a   :  { %232 = vmatprep.subr.bf16.mxu0 %v231_v12  ;;  %v241_v28 = vpack.c.bf16 %v85_v25, %v83_v24  ;;  %v243_v29 = vpack.c.bf16 %v90_v27, %v88_v26  ;;  %v87_v30 = vld [vmem:[#allocation3 + $0x80] sm:$0xff]  ;;  %v89_v31 = vld [vmem:[#allocation3 + $0x90] sm:$0xff]  ;;  %v92_v32 = vld [vmem:[#allocation3 + $0xa8] sm:$0xff] }
  0x1b   :  { %v94_v33 = vld [vmem:[#allocation3 + $0xb8] sm:$0xff]  ;;  %v245_v34 = vpack.c.bf16 %v89_v31, %v87_v30  ;;  %v91_v36 = vld [vmem:[#allocation3 + $0xa0] sm:$0xff]  ;;  %v93_v37 = vld [vmem:[#allocation3 + $0xb0] sm:$0xff] }
  0x1c   :  { %v247_v35 = vpack.c.bf16 %v94_v33, %v92_v32  ;;  %v96_v38 = vld [vmem:[#allocation3 + $0xc8] sm:$0xff]  ;;  %v98_v39 = vld [vmem:[#allocation3 + $0xd8] sm:$0xff]  ;;  %v249_v40 = vpack.c.bf16 %v93_v37, %v91_v36  ;;  %v95_v42 = vld [vmem:[#allocation3 + $0xc0] sm:$0xff] }
  0x1d   :  { %234 = vmatpush1.bf16.msra.mxu0 %v233_v16  ;;  %v251_v41 = vpack.c.bf16 %v98_v39, %v96_v38  ;;  %v97_v43 = vld [vmem:[#allocation3 + $0xd0] sm:$0xff]  ;;  %v100_v44 = vld [vmem:[#allocation3 + $0xe8] sm:$0xff]  ;;  %v102_v45 = vld [vmem:[#allocation3 + $0xf8] sm:$0xff] }
  0x1e   :  { %236 = vmatprep.subr.bf16.mxu0 %v235_v17  ;;  %v253_v46 = vpack.c.bf16 %v97_v43, %v95_v42  ;;  %v255_v47 = vpack.c.bf16 %v102_v45, %v100_v44  ;;  %v99_v48 = vld [vmem:[#allocation3 + $0xe0] sm:$0xff]  ;;  %v101_v49 = vld [vmem:[#allocation3 + $0xf0] sm:$0xff]  ;;  %v104_v50 = vld [vmem:[#allocation3 + $0x108] sm:$0xff]  ;;  %v352_v43 = vmov 1.0  }
  0x1f   :  { %v106_v51 = vld [vmem:[#allocation3 + $0x118] sm:$0xff]  ;;  %v257_v52 = vpack.c.bf16 %v101_v49, %v99_v48  ;;  %v103_v54 = vld [vmem:[#allocation3 + $0x100] sm:$0xff]  ;;  %v105_v55 = vld [vmem:[#allocation3 + $0x110] sm:$0xff] }
  0x20   :  { %v259_v53 = vpack.c.bf16 %v106_v51, %v104_v50  ;;  %v108_v56 = vld [vmem:[#allocation3 + $0x128] sm:$0xff]  ;;  %v110_v57 = vld [vmem:[#allocation3 + $0x138] sm:$0xff]  ;;  %v261_v58 = vpack.c.bf16 %v105_v55, %v103_v54  ;;  %v107_v60 = vld [vmem:[#allocation3 + $0x120] sm:$0xff] }
  0x21   :  { %238 = vmatpush1.bf16.msra.mxu0 %v237_v22  ;;  %v263_v59 = vpack.c.bf16 %v110_v57, %v108_v56  ;;  %v109_v61 = vld [vmem:[#allocation3 + $0x130] sm:$0xff]  ;;  %v112_v62 = vld [vmem:[#allocation3 + $0x148] sm:$0xff]  ;;  %v114_v63 = vld [vmem:[#allocation3 + $0x158] sm:$0xff] }
  0x22   :  { %240 = vmatprep.subr.bf16.mxu0 %v239_v23  ;;  %v265_v0 = vpack.c.bf16 %v109_v61, %v107_v60  ;;  %v267_v1 = vpack.c.bf16 %v114_v63, %v112_v62  ;;  %v111_v2 = vld [vmem:[#allocation3 + $0x140] sm:$0xff]  ;;  %v113_v3 = vld [vmem:[#allocation3 + $0x150] sm:$0xff]  ;;  %v116_v4 = vld [vmem:[#allocation3 + $0x168] sm:$0xff] }
  0x23   :  { %v118_v5 = vld [vmem:[#allocation3 + $0x178] sm:$0xff]  ;;  %v269_v6 = vpack.c.bf16 %v113_v3, %v111_v2  ;;  %v115_v8 = vld [vmem:[#allocation3 + $0x160] sm:$0xff]  ;;  %v117_v9 = vld [vmem:[#allocation3 + $0x170] sm:$0xff] }
  0x24   :  { %v271_v7 = vpack.c.bf16 %v118_v5, %v116_v4  ;;  %v120_v10 = vld [vmem:[#allocation3 + $0x188] sm:$0xff]  ;;  %v122_v11 = vld [vmem:[#allocation3 + $0x198] sm:$0xff]  ;;  %v273_v12 = vpack.c.bf16 %v117_v9, %v115_v8  ;;  %v119_v14 = vld [vmem:[#allocation3 + $0x180] sm:$0xff] }
  0x25   :  { %242 = vmatpush1.bf16.msra.mxu0 %v241_v28  ;;  %v275_v13 = vpack.c.bf16 %v122_v11, %v120_v10  ;;  %v121_v15 = vld [vmem:[#allocation3 + $0x190] sm:$0xff]  ;;  %v124_v16 = vld [vmem:[#allocation3 + $0x1a8] sm:$0xff]  ;;  %v126_v17 = vld [vmem:[#allocation3 + $0x1b8] sm:$0xff] }
  0x26   :  { %244 = vmatprep.subr.bf16.mxu0 %v243_v29  ;;  %v277_v18 = vpack.c.bf16 %v121_v15, %v119_v14  ;;  %v279_v19 = vpack.c.bf16 %v126_v17, %v124_v16  ;;  %v123_v20 = vld [vmem:[#allocation3 + $0x1a0] sm:$0xff]  ;;  %v125_v21 = vld [vmem:[#allocation3 + $0x1b0] sm:$0xff]  ;;  %v128_v22 = vld [vmem:[#allocation3 + $0x1c8] sm:$0xff] }
  0x27   :  { %v130_v23 = vld [vmem:[#allocation3 + $0x1d8] sm:$0xff]  ;;  %v281_v24 = vpack.c.bf16 %v125_v21, %v123_v20  ;;  %v127_v26 = vld [vmem:[#allocation3 + $0x1c0] sm:$0xff]  ;;  %v129_v27 = vld [vmem:[#allocation3 + $0x1d0] sm:$0xff] }
  0x28   :  { %v283_v25 = vpack.c.bf16 %v130_v23, %v128_v22  ;;  %v132_v28 = vld [vmem:[#allocation3 + $0x1e8] sm:$0xff]  ;;  %v134_v29 = vld [vmem:[#allocation3 + $0x1f8] sm:$0xff]  ;;  %v285_v30 = vpack.c.bf16 %v129_v27, %v127_v26  ;;  %v131_v32 = vld [vmem:[#allocation3 + $0x1e0] sm:$0xff] }
  0x29   :  { %246 = vmatpush1.bf16.msra.mxu0 %v245_v34  ;;  %v287_v31 = vpack.c.bf16 %v134_v29, %v132_v28  ;;  %v133_v33 = vld [vmem:[#allocation3 + $0x1f0] sm:$0xff]  ;;  %v223_v36 = vld [vmem:[%s422_s2] ss:$0 sm:$0xff]  ;;  %s322_s2 = scalar_lea.vmem %s215_s13, 256 }
  0x2a   :  { %248 = vmatprep.subr.bf16.mxu0 %v247_v35  ;;  %v289_v34 = vpack.c.bf16 %v133_v33, %v131_v32  ;;  %v59_v35 = vlaneseq  ;;  %v224_v37 = vld [vmem:[%s423_s3] ss:$0 sm:$0xff]  ;;  %p323_p8 = scmp.ne.s32.totalorder %s215_s13, %s322_s2  ;;  %p328_p10 = scmp.lt.s32.totalorder %s322_s2, %s322_s2 }
  0x2c   :  { %p329_p11 = por %p328_p10, %p327_p9 }
  0x2d   :  { %250 = vmatpush1.bf16.msra.mxu0 %v249_v40  ;;  %v60_v40 = vand.u32 127, %v59_v35 }
  0x2e   :  { %252 = vmatprep.subr.bf16.mxu0 %v251_v41  ;;  %p330_p12 = pnand %p329_p11, %p323_p8 }
  0x31   :  { %254 = vmatpush1.bf16.msra.mxu0 %v253_v46 }
  0x32   :  { %256 = vmatprep.subr.bf16.mxu0 %v255_v47 }
  0x35   :  { %258 = vmatpush1.bf16.msra.mxu0 %v257_v52 }
  0x36   :  { %260 = vmatprep.subr.bf16.mxu0 %v259_v53 }
  0x39   :  { %262 = vmatpush1.bf16.msra.mxu0 %v261_v58 }
  0x3a   :  { %264 = vmatprep.subr.bf16.mxu0 %v263_v59 }
  0x3d   :  { %266 = vmatpush1.bf16.msra.mxu0 %v265_v0 }
  0x3e   :  { %268 = vmatprep.subr.bf16.mxu0 %v267_v1 }
  0x41   :  { %270 = vmatpush1.bf16.msra.mxu0 %v269_v6 }
  0x42   :  { %272 = vmatprep.subr.bf16.mxu0 %v271_v7 }
  0x45   :  { %274 = vmatpush1.bf16.msra.mxu0 %v273_v12 }
  0x46   :  { %276 = vmatprep.subr.bf16.mxu0 %v275_v13 }
  0x49   :  { %278 = vmatpush1.bf16.msra.mxu0 %v277_v18 }
  0x4a   :  { %280 = vmatprep.subr.bf16.mxu0 %v279_v19 }
  0x4d   :  { %282 = vmatpush1.bf16.msra.mxu0 %v281_v24 }
  0x4e   :  { %284 = vmatprep.subr.bf16.mxu0 %v283_v25 }
  0x51   :  { %286 = vmatpush1.bf16.msra.mxu0 %v285_v30 }
  0x52   :  { %288 = vmatprep.subr.bf16.mxu0 %v287_v31 }
  0x55   :  { %290 = vmatpush1.bf16.msra.mxu0 %v289_v34 }
  0x94   :  { %v40_v38 = vpop.permute.xlu0 %39 }
  0x95   :  { %v48_v39 = vmul.f32 %v223_v36, %v40_v38 }
  0x97   :  { %v56_v41 = vadd.f32 %v224_v37, %v48_v39 }
  0x98   :  { %v64_v42 = vpop.permute.xlu0 %63 }
  0x99   :  { %298 = vtanh.f32 %v56_v41  ;;  %vm65_vm0 = vcmp.eq.s32.totalorder %v60_v40, %v64_v42 }
  0x9a   :  { %226 = vmatprep.mubr.msk.f32.mxu0 %vm65_vm0, %v352_v43 }
  0xa3   :  { %v299_v44 = vpop.eup %298 }
  0xa4   :  { %200 = vmatmul.mubr.f32.vlgmr.msra.gmra.mrb[0].mxu0 %v299_v44 }
 0x177   :  { %v201_v45 = vpop.f32.mrb[0].mxu0 }
 0x178   :  { %206 = vst [vmem:[#allocation6] sm:$0xff] %v201_v45  ;;  %v203_v46 = vpop.f32.mrb[1].mxu0 }
 0x179   :  { %207 = vst [vmem:[#allocation6 + $0x8] sm:$0xff] %v203_v46 }
 0x17a   :  { %333 = shalt.err (!%p330_p12)
}
 0x17b   :  { %s334_s15 = scalar_lea.hbm %s425_s5, 256 }
 0x17c   :  { %p335_p13 = scmp.ne.s32.totalorder %s425_s5, %s334_s15  ;;  %p338_p0 = scmp.lt.u32.totalorder %s334_s15, %s425_s5 }
 0x17e   :  { %p340_p1 = pnand %p338_p0, %p335_p13 }
 0x180   :  { %343 = shalt.err (!%p340_p1)
}
 0x181   :  { %217 = dma.vmem_to_hbm [thread:$0]  %s215_s13, 256, %s425_s5, [#allocation5]  }
 0x182   :  { %346 = dma.done.wait [#allocation5], 256  }
 0x183   :  { %347 = vsyncadd [#allocation5], 4294967040 }
 0x184   :  { %221 = vsyncpa [#allocation4], 1 }
 0x185   :  { %222 = vsyncpa [#allocation5], 1 }

</bundles_post_ra>
